<compile_context>
chip_gen: v6e
topology: v6e:2x2x1
jax: 0.10.0
libtpu: 0.0.40
codegen_flags: <defaults>
</compile_context>

<pallas_src>
import functools

import numpy as np

import jax
import jax.numpy as jnp
from jax.experimental import pallas as pl
from jax.experimental.pallas import tpu as pltpu


# -----------------------------------------------------------------------------
# Fused kernel: input projection -> packed dual-LSTM recurrence -> MLP head
# Packed gate column layout (8H columns), blocks ordered i, f, o, g, each
# block = [gate_vol (H) | gate_ord (H)].
# Packed state layout (2H columns): [ h_vol | h_ord ], [ c_vol | c_ord ].
# -----------------------------------------------------------------------------
def _fused_kernel(xv_ref, xo_ref, perm_ref, wiv_ref, wio_ref, whh_ref, b_ref,
                  w1_ref, b1_ref, w2_ref, b2_ref, out_ref, *, T, B, Bp):
    G = whh_ref.shape[0]           # packed state width  2*H   [h_vol | h_ord]
    G4 = whh_ref.shape[1]          # packed gate  width  8*H   [ i | f | o | g ]

    # ---------- input projection (hoisted, one-time) -------------------------
    # orderbook stream (K=5): one bf16 MXU matmul; volatility stream (K=1):
    # VPU broadcast-FMA (a K=1 MXU contraction is pure latency).
    xproj = jnp.dot(xo_ref[...].astype(jnp.bfloat16), wio_ref[...],
                    preferred_element_type=jnp.float32)
    xproj = xproj + xv_ref[...] * wiv_ref[...]                  # (B*T, G4) f32

    # ---------- relayout to time-major with batch padded to Bp ---------------
    # perm is a constant 0/1 matrix: dest row t*Bp+b <- src row b*T+t (zero
    # rows for the Bp-B pad rows).  One tiny MXU matmul replaces both the old
    # wrapper-side transpose fusion and per-step sub-sublane slicing: every
    # step's gate slab below is an aligned [t*Bp:(t+1)*Bp) slice.  Pad rows
    # never contaminate real rows (the recurrence is row-wise independent)
    # and are dropped at the end.
    xproj = jnp.dot(perm_ref[...], xproj.astype(jnp.bfloat16),
                    preferred_element_type=jnp.float32) + b_ref[...]

    whh = whh_ref[...]                                          # (G, G4) bf16
    hc = jnp.zeros((Bp, G), jnp.float32)                        # [h_vol | h_ord]
    cc = jnp.zeros((Bp, G), jnp.float32)                        # [c_vol | c_ord]

    # ---------- serial recurrence (T small & static -> fully unrolled) -------
    for t in range(T):
        gates = xproj[t * Bp:(t + 1) * Bp, :] + jnp.dot(
            hc.astype(jnp.bfloat16), whh, preferred_element_type=jnp.float32)
        sig = jax.nn.sigmoid(gates[:, :3 * G])     # i|f|o together: 1 launch
        g_g = jnp.tanh(gates[:, 3 * G:])           # g            : 1 launch
        i_g = sig[:, :G]
        f_g = sig[:, G:2 * G]
        o_g = sig[:, 2 * G:]
        cc = f_g * cc + i_g * g_g
        hc = o_g * jnp.tanh(cc)

    # ---------- MLP head (dropout == identity in eval/inference mode) --------
    d = jnp.maximum(
        jnp.dot(hc.astype(jnp.bfloat16), w1_ref[...],
                preferred_element_type=jnp.float32) + b1_ref[...], 0.0)
    out = jnp.maximum(
        jnp.dot(d.astype(jnp.bfloat16), w2_ref[...],
                preferred_element_type=jnp.float32) + b2_ref[...], 0.0)
    out_ref[...] = out[:B, :]                       # drop batch pad rows


# -----------------------------------------------------------------------------
# One-time parameter preparation (transposes, bias folding, block-diag packing,
# gate reordering i,f,o,g, bf16 casts for all MXU operands)
# -----------------------------------------------------------------------------
def prepare_params(params):
    H = params["vol_w_hh"].shape[1]
    Dv = params["vol_w_ih"].shape[1]
    Do = params["ord_w_ih"].shape[1]
    assert Dv == 1, "lstm_vol input size is 1 in DualLSTMModel"
    bv = params["vol_b_ih"] + params["vol_b_hh"]
    bo = params["ord_b_ih"] + params["ord_b_hh"]

    G4 = 8 * H
    w_in_v = jnp.zeros((1, G4), jnp.float32)
    w_in_o = jnp.zeros((Do, G4), jnp.float32)
    w_hh = jnp.zeros((2 * H, G4), jnp.float32)
    b_g = jnp.zeros((1, G4), jnp.float32)
    # Packed gate-block order: i, f, o, g  (sigmoid gates contiguous, tanh
    # gate last).  PyTorch row-block order inside w_ih/w_hh is i, f, g, o.
    for p, k in enumerate((0, 1, 3, 2)):
        c0 = 2 * p * H
        w_in_v = w_in_v.at[:, c0:c0 + H].set(
            params["vol_w_ih"][k * H:(k + 1) * H, :].T)
        w_in_o = w_in_o.at[:, c0 + H:c0 + 2 * H].set(
            params["ord_w_ih"][k * H:(k + 1) * H, :].T)
        w_hh = w_hh.at[0:H, c0:c0 + H].set(
            params["vol_w_hh"][k * H:(k + 1) * H, :].T)
        w_hh = w_hh.at[H:, c0 + H:c0 + 2 * H].set(
            params["ord_w_hh"][k * H:(k + 1) * H, :].T)
        b_g = b_g.at[0, c0:c0 + H].set(bv[k * H:(k + 1) * H])
        b_g = b_g.at[0, c0 + H:c0 + 2 * H].set(bo[k * H:(k + 1) * H])

    return {
        "w_in_v": w_in_v,                               # f32  (VPU operand, K=1)
        "w_in_o": w_in_o.astype(jnp.bfloat16),          # bf16 MXU operand
        "w_hh": w_hh.astype(jnp.bfloat16),              # bf16 MXU operand
        "b_gates": b_g,                                 # f32
        "w1": params["fc1_w"].T.astype(jnp.bfloat16),   # (2H, H2) bf16
        "b1": params["fc1_b"].reshape(1, -1),           # (1, H2) f32
        "w2": params["fc2_w"].T.astype(jnp.bfloat16),   # (H2, 1) bf16
        "b2": params["fc2_b"].reshape(1, 1),            # (1, 1) f32
    }


# -----------------------------------------------------------------------------
# Forward wrapper: ONE grid-less pallas_call, no wrapper-side data relayout
# -----------------------------------------------------------------------------
@jax.jit
def dual_lstm_forward(prep, x_vol, x_ord):
    B, T, Dv = x_vol.shape
    Do = x_ord.shape[2]
    Bp = max(8, -(-B // 8) * 8)          # batch rows padded to a sublane tile

    # (B, T, D) -> (B*T, D): contiguous row-major reshape (free bitcast),
    # unlike the old time-major transpose which was its own XLA fusion.
    xv2 = x_vol.reshape(B * T, Dv)
    xo2 = x_ord.reshape(B * T, Do)

    # Trace-time constant permutation (b-major rows -> time-major, padded).
    perm = np.zeros((T * Bp, B * T), np.float32)
    for t in range(T):
        for b in range(B):
            perm[t * Bp + b, b * T + t] = 1.0
    perm = jnp.asarray(perm, jnp.bfloat16)

    kernel = functools.partial(_fused_kernel, T=T, B=B, Bp=Bp)
    vmem = lambda: pl.BlockSpec(memory_space=pltpu.MemorySpace.VMEM)

    # Single fused kernel, no grid: at these sizes everything (a few KiB)
    # lives in VMEM and a 1-point grid would only add per-step machinery.
    # TODO(synk): for large batches, add a leading "parallel" batch-tile grid
    # axis so both v7x TensorCores get work and per-tile VMEM stays bounded.
    return pl.pallas_call(
        kernel,
        out_shape=jax.ShapeDtypeStruct((B, 1), jnp.float32),
        in_specs=[vmem() for _ in range(11)],
        out_specs=vmem(),
    )(xv2, xo2, perm, prep["w_in_v"], prep["w_in_o"], prep["w_hh"],
      prep["b_gates"], prep["w1"], prep["b1"], prep["w2"], prep["b2"])


# -----------------------------------------------------------------------------
# Pure-JAX reference (f32, for correctness verification only)
# -----------------------------------------------------------------------------
def _lstm_ref(x_btd, w_ih, w_hh, b_ih, b_hh):
    B, T, D = x_btd.shape
    H = w_hh.shape[1]
    h = jnp.zeros((B, H), jnp.float32)
    c = jnp.zeros((B, H), jnp.float32)
    for t in range(T):
        g = x_btd[:, t, :] @ w_ih.T + b_ih + h @ w_hh.T + b_hh
        i = jax.nn.sigmoid(g[:, 0 * H:1 * H])
        f = jax.nn.sigmoid(g[:, 1 * H:2 * H])
        gg = jnp.tanh(g[:, 2 * H:3 * H])
        o = jax.nn.sigmoid(g[:, 3 * H:4 * H])
        c = f * c + i * gg
        h = o * jnp.tanh(c)
    return h


def _forward_ref(params, x_vol, x_ord):
    hv = _lstm_ref(x_vol, params["vol_w_ih"], params["vol_w_hh"],
                   params["vol_b_ih"], params["vol_b_hh"])
    ho = _lstm_ref(x_ord, params["ord_w_ih"], params["ord_w_hh"],
                   params["ord_b_ih"], params["ord_b_hh"])
    h = jnp.concatenate([hv, ho], axis=1)
    d = jnp.maximum(h @ params["fc1_w"].T + params["fc1_b"], 0.0)
    return jnp.maximum(d @ params["fc2_w"].T + params["fc2_b"], 0.0)


# -----------------------------------------------------------------------------
# Deterministic parameter init (same shapes as the PyTorch module __init__,
# scaled down: hidden_size_1 = hidden_size_2 = 32)
# -----------------------------------------------------------------------------
def init_params(key, hidden1=32, hidden2=32):
    def u(k, shape, scale):
        return jax.random.uniform(k, shape, jnp.float32, -scale, scale)

    ks = jax.random.split(key, 12)
    s1 = 1.0 / jnp.sqrt(hidden1)
    s2 = 1.0 / jnp.sqrt(hidden2)
    return {
        # lstm_vol: input_size = 1
        "vol_w_ih": u(ks[0], (4 * hidden1, 1), s1),
        "vol_w_hh": u(ks[1], (4 * hidden1, hidden1), s1),
        "vol_b_ih": u(ks[2], (4 * hidden1,), s1),
        "vol_b_hh": u(ks[3], (4 * hidden1,), s1),
        # lstm_orderbook: input_size = 5
        "ord_w_ih": u(ks[4], (4 * hidden1, 5), s1),
        "ord_w_hh": u(ks[5], (4 * hidden1, hidden1), s1),
        "ord_b_ih": u(ks[6], (4 * hidden1,), s1),
        "ord_b_hh": u(ks[7], (4 * hidden1,), s1),
        # fc1: (hidden2, 2*hidden1), fc2: (1, hidden2)
        "fc1_w": u(ks[8], (hidden2, 2 * hidden1), s2),
        "fc1_b": u(ks[9], (hidden2,), s2),
        "fc2_w": u(ks[10], (1, hidden2), s2),
        "fc2_b": u(ks[11], (1,), s2),
    }


if __name__ == "__main__":
    key = jax.random.PRNGKey(0)
    k_p, k_v, k_o = jax.random.split(key, 3)

    B, T, H = 4, 8, 32
    params = init_params(k_p, hidden1=H, hidden2=H)
    x_vol = jax.random.normal(k_v, (B, T, 1), jnp.float32)   # volatility seq
    x_ord = jax.random.normal(k_o, (B, T, 5), jnp.float32)   # orderbook seq

    prep = prepare_params(params)                            # one-time weight prep
    out = jax.block_until_ready(dual_lstm_forward(prep, x_vol, x_ord))
    ref = jax.block_until_ready(_forward_ref(params, x_vol, x_ord))

    assert out.shape == (B, 1), out.shape
    # bf16 MXU operands (f32 accumulate) vs a pure-f32 reference -> relaxed
    # tolerance; structural bugs show up as O(0.1+) errors.
    err = float(jnp.max(jnp.abs(out - ref)))
    assert err < 4e-2, (err, out, ref)
    print("KERNEL_OK")
</pallas_src>

<mosaic_0001>
module attributes {stable_mosaic.version = 11 : i64} {
  func.func @_fused_kernel(%arg0: memref<32x1xf32, #tpu.memory_space<vmem>>, %arg1: memref<32x5xf32, #tpu.memory_space<vmem>>, %arg2: memref<64x32xbf16, #tpu.memory_space<vmem>>, %arg3: memref<1x256xf32, #tpu.memory_space<vmem>>, %arg4: memref<5x256xbf16, #tpu.memory_space<vmem>>, %arg5: memref<64x256xbf16, #tpu.memory_space<vmem>>, %arg6: memref<1x256xf32, #tpu.memory_space<vmem>>, %arg7: memref<64x32xbf16, #tpu.memory_space<vmem>>, %arg8: memref<1x32xf32, #tpu.memory_space<vmem>>, %arg9: memref<32x1xbf16, #tpu.memory_space<vmem>>, %arg10: memref<1x1xf32, #tpu.memory_space<vmem>>, %arg11: memref<4x1xf32, #tpu.memory_space<vmem>>) attributes {dimension_semantics = [], scalar_prefetch = 0 : i64, scratch_operands = 0 : i64, tpu.core_type = #tpu.core_type<tc>} {
    %c0 = arith.constant 0 : index
    %c0_0 = arith.constant 0 : index
    %0 = vector.load %arg1[%c0, %c0_0] : memref<32x5xf32, #tpu.memory_space<vmem>>, vector<32x5xf32>
    %1 = arith.truncf %0 : vector<32x5xf32> to vector<32x5xbf16>
    %c0_1 = arith.constant 0 : index
    %c0_2 = arith.constant 0 : index
    %2 = vector.load %arg4[%c0_1, %c0_2] : memref<5x256xbf16, #tpu.memory_space<vmem>>, vector<5x256xbf16>
    %cst = arith.constant dense<0.000000e+00> : vector<32x256xf32>
    %3 = tpu.matmul %1, %2, %cst {dimension_numbers = #tpu.dot_dimension_numbers<[1], [0], [0], [1], [0, 0, 1, 1], [], []>} : vector<32x5xbf16>, vector<5x256xbf16>, vector<32x256xf32> -> vector<32x256xf32>
    %c0_3 = arith.constant 0 : index
    %c0_4 = arith.constant 0 : index
    %4 = vector.load %arg0[%c0_3, %c0_4] : memref<32x1xf32, #tpu.memory_space<vmem>>, vector<32x1xf32>
    %c0_5 = arith.constant 0 : index
    %c0_6 = arith.constant 0 : index
    %5 = vector.load %arg3[%c0_5, %c0_6] : memref<1x256xf32, #tpu.memory_space<vmem>>, vector<1x256xf32>
    %6 = vector.broadcast %4 : vector<32x1xf32> to vector<32x256xf32>
    %7 = vector.broadcast %5 : vector<1x256xf32> to vector<32x256xf32>
    %8 = arith.mulf %6, %7 : vector<32x256xf32>
    %9 = arith.addf %3, %8 : vector<32x256xf32>
    %c0_7 = arith.constant 0 : index
    %c0_8 = arith.constant 0 : index
    %10 = vector.load %arg2[%c0_7, %c0_8] : memref<64x32xbf16, #tpu.memory_space<vmem>>, vector<64x32xbf16>
    %11 = arith.truncf %9 : vector<32x256xf32> to vector<32x256xbf16>
    %cst_9 = arith.constant dense<0.000000e+00> : vector<64x256xf32>
    %12 = tpu.matmul %10, %11, %cst_9 {dimension_numbers = #tpu.dot_dimension_numbers<[1], [0], [0], [1], [0, 0, 1, 1], [], []>} : vector<64x32xbf16>, vector<32x256xbf16>, vector<64x256xf32> -> vector<64x256xf32>
    %c0_10 = arith.constant 0 : index
    %c0_11 = arith.constant 0 : index
    %13 = vector.load %arg6[%c0_10, %c0_11] : memref<1x256xf32, #tpu.memory_space<vmem>>, vector<1x256xf32>
    %14 = vector.broadcast %13 : vector<1x256xf32> to vector<64x256xf32>
    %15 = arith.addf %12, %14 : vector<64x256xf32>
    %c0_12 = arith.constant 0 : index
    %c0_13 = arith.constant 0 : index
    %16 = vector.load %arg5[%c0_12, %c0_13] : memref<64x256xbf16, #tpu.memory_space<vmem>>, vector<64x256xbf16>
    %cst_14 = arith.constant 0.000000e+00 : f32
    %17 = vector.broadcast %cst_14 : f32 to vector<8x64xf32>
    %cst_15 = arith.constant 0.000000e+00 : f32
    %18 = vector.broadcast %cst_15 : f32 to vector<8x64xf32>
    %19 = vector.extract_strided_slice %15 {offsets = [0, 0], sizes = [8, 256], strides = [1, 1]} : vector<64x256xf32> to vector<8x256xf32>
    %20 = arith.truncf %17 : vector<8x64xf32> to vector<8x64xbf16>
    %cst_16 = arith.constant dense<0.000000e+00> : vector<8x256xf32>
    %21 = tpu.matmul %20, %16, %cst_16 {dimension_numbers = #tpu.dot_dimension_numbers<[1], [0], [0], [1], [0, 0, 1, 1], [], []>} : vector<8x64xbf16>, vector<64x256xbf16>, vector<8x256xf32> -> vector<8x256xf32>
    %22 = arith.addf %19, %21 : vector<8x256xf32>
    %23 = vector.extract_strided_slice %22 {offsets = [0, 0], sizes = [8, 192], strides = [1, 1]} : vector<8x256xf32> to vector<8x192xf32>
    %24 = arith.negf %23 : vector<8x192xf32>
    %25 = math.exp %24 : vector<8x192xf32>
    %cst_17 = arith.constant 1.000000e+00 : f32
    %26 = vector.broadcast %cst_17 : f32 to vector<8x192xf32>
    %27 = arith.addf %26, %25 : vector<8x192xf32>
    %28 = arith.divf %26, %27 : vector<8x192xf32>
    %29 = vector.extract_strided_slice %22 {offsets = [0, 192], sizes = [8, 64], strides = [1, 1]} : vector<8x256xf32> to vector<8x64xf32>
    %30 = math.tanh %29 : vector<8x64xf32>
    %31 = vector.extract_strided_slice %28 {offsets = [0, 0], sizes = [8, 64], strides = [1, 1]} : vector<8x192xf32> to vector<8x64xf32>
    %32 = vector.extract_strided_slice %28 {offsets = [0, 64], sizes = [8, 64], strides = [1, 1]} : vector<8x192xf32> to vector<8x64xf32>
    %33 = vector.extract_strided_slice %28 {offsets = [0, 128], sizes = [8, 64], strides = [1, 1]} : vector<8x192xf32> to vector<8x64xf32>
    %34 = arith.mulf %32, %18 : vector<8x64xf32>
    %35 = arith.mulf %31, %30 : vector<8x64xf32>
    %36 = arith.addf %34, %35 : vector<8x64xf32>
    %37 = math.tanh %36 : vector<8x64xf32>
    %38 = arith.mulf %33, %37 : vector<8x64xf32>
    %39 = vector.extract_strided_slice %15 {offsets = [8, 0], sizes = [8, 256], strides = [1, 1]} : vector<64x256xf32> to vector<8x256xf32>
    %40 = arith.truncf %38 : vector<8x64xf32> to vector<8x64xbf16>
    %cst_18 = arith.constant dense<0.000000e+00> : vector<8x256xf32>
    %41 = tpu.matmul %40, %16, %cst_18 {dimension_numbers = #tpu.dot_dimension_numbers<[1], [0], [0], [1], [0, 0, 1, 1], [], []>} : vector<8x64xbf16>, vector<64x256xbf16>, vector<8x256xf32> -> vector<8x256xf32>
    %42 = arith.addf %39, %41 : vector<8x256xf32>
    %43 = vector.extract_strided_slice %42 {offsets = [0, 0], sizes = [8, 192], strides = [1, 1]} : vector<8x256xf32> to vector<8x192xf32>
    %44 = arith.negf %43 : vector<8x192xf32>
    %45 = math.exp %44 : vector<8x192xf32>
    %cst_19 = arith.constant 1.000000e+00 : f32
    %46 = vector.broadcast %cst_19 : f32 to vector<8x192xf32>
    %47 = arith.addf %46, %45 : vector<8x192xf32>
    %48 = arith.divf %46, %47 : vector<8x192xf32>
    %49 = vector.extract_strided_slice %42 {offsets = [0, 192], sizes = [8, 64], strides = [1, 1]} : vector<8x256xf32> to vector<8x64xf32>
    %50 = math.tanh %49 : vector<8x64xf32>
    %51 = vector.extract_strided_slice %48 {offsets = [0, 0], sizes = [8, 64], strides = [1, 1]} : vector<8x192xf32> to vector<8x64xf32>
    %52 = vector.extract_strided_slice %48 {offsets = [0, 64], sizes = [8, 64], strides = [1, 1]} : vector<8x192xf32> to vector<8x64xf32>
    %53 = vector.extract_strided_slice %48 {offsets = [0, 128], sizes = [8, 64], strides = [1, 1]} : vector<8x192xf32> to vector<8x64xf32>
    %54 = arith.mulf %52, %36 : vector<8x64xf32>
    %55 = arith.mulf %51, %50 : vector<8x64xf32>
    %56 = arith.addf %54, %55 : vector<8x64xf32>
    %57 = math.tanh %56 : vector<8x64xf32>
    %58 = arith.mulf %53, %57 : vector<8x64xf32>
    %59 = vector.extract_strided_slice %15 {offsets = [16, 0], sizes = [8, 256], strides = [1, 1]} : vector<64x256xf32> to vector<8x256xf32>
    %60 = arith.truncf %58 : vector<8x64xf32> to vector<8x64xbf16>
    %cst_20 = arith.constant dense<0.000000e+00> : vector<8x256xf32>
    %61 = tpu.matmul %60, %16, %cst_20 {dimension_numbers = #tpu.dot_dimension_numbers<[1], [0], [0], [1], [0, 0, 1, 1], [], []>} : vector<8x64xbf16>, vector<64x256xbf16>, vector<8x256xf32> -> vector<8x256xf32>
    %62 = arith.addf %59, %61 : vector<8x256xf32>
    %63 = vector.extract_strided_slice %62 {offsets = [0, 0], sizes = [8, 192], strides = [1, 1]} : vector<8x256xf32> to vector<8x192xf32>
    %64 = arith.negf %63 : vector<8x192xf32>
    %65 = math.exp %64 : vector<8x192xf32>
    %cst_21 = arith.constant 1.000000e+00 : f32
    %66 = vector.broadcast %cst_21 : f32 to vector<8x192xf32>
    %67 = arith.addf %66, %65 : vector<8x192xf32>
    %68 = arith.divf %66, %67 : vector<8x192xf32>
    %69 = vector.extract_strided_slice %62 {offsets = [0, 192], sizes = [8, 64], strides = [1, 1]} : vector<8x256xf32> to vector<8x64xf32>
    %70 = math.tanh %69 : vector<8x64xf32>
    %71 = vector.extract_strided_slice %68 {offsets = [0, 0], sizes = [8, 64], strides = [1, 1]} : vector<8x192xf32> to vector<8x64xf32>
    %72 = vector.extract_strided_slice %68 {offsets = [0, 64], sizes = [8, 64], strides = [1, 1]} : vector<8x192xf32> to vector<8x64xf32>
    %73 = vector.extract_strided_slice %68 {offsets = [0, 128], sizes = [8, 64], strides = [1, 1]} : vector<8x192xf32> to vector<8x64xf32>
    %74 = arith.mulf %72, %56 : vector<8x64xf32>
    %75 = arith.mulf %71, %70 : vector<8x64xf32>
    %76 = arith.addf %74, %75 : vector<8x64xf32>
    %77 = math.tanh %76 : vector<8x64xf32>
    %78 = arith.mulf %73, %77 : vector<8x64xf32>
    %79 = vector.extract_strided_slice %15 {offsets = [24, 0], sizes = [8, 256], strides = [1, 1]} : vector<64x256xf32> to vector<8x256xf32>
    %80 = arith.truncf %78 : vector<8x64xf32> to vector<8x64xbf16>
    %cst_22 = arith.constant dense<0.000000e+00> : vector<8x256xf32>
    %81 = tpu.matmul %80, %16, %cst_22 {dimension_numbers = #tpu.dot_dimension_numbers<[1], [0], [0], [1], [0, 0, 1, 1], [], []>} : vector<8x64xbf16>, vector<64x256xbf16>, vector<8x256xf32> -> vector<8x256xf32>
    %82 = arith.addf %79, %81 : vector<8x256xf32>
    %83 = vector.extract_strided_slice %82 {offsets = [0, 0], sizes = [8, 192], strides = [1, 1]} : vector<8x256xf32> to vector<8x192xf32>
    %84 = arith.negf %83 : vector<8x192xf32>
    %85 = math.exp %84 : vector<8x192xf32>
    %cst_23 = arith.constant 1.000000e+00 : f32
    %86 = vector.broadcast %cst_23 : f32 to vector<8x192xf32>
    %87 = arith.addf %86, %85 : vector<8x192xf32>
    %88 = arith.divf %86, %87 : vector<8x192xf32>
    %89 = vector.extract_strided_slice %82 {offsets = [0, 192], sizes = [8, 64], strides = [1, 1]} : vector<8x256xf32> to vector<8x64xf32>
    %90 = math.tanh %89 : vector<8x64xf32>
    %91 = vector.extract_strided_slice %88 {offsets = [0, 0], sizes = [8, 64], strides = [1, 1]} : vector<8x192xf32> to vector<8x64xf32>
    %92 = vector.extract_strided_slice %88 {offsets = [0, 64], sizes = [8, 64], strides = [1, 1]} : vector<8x192xf32> to vector<8x64xf32>
    %93 = vector.extract_strided_slice %88 {offsets = [0, 128], sizes = [8, 64], strides = [1, 1]} : vector<8x192xf32> to vector<8x64xf32>
    %94 = arith.mulf %92, %76 : vector<8x64xf32>
    %95 = arith.mulf %91, %90 : vector<8x64xf32>
    %96 = arith.addf %94, %95 : vector<8x64xf32>
    %97 = math.tanh %96 : vector<8x64xf32>
    %98 = arith.mulf %93, %97 : vector<8x64xf32>
    %99 = vector.extract_strided_slice %15 {offsets = [32, 0], sizes = [8, 256], strides = [1, 1]} : vector<64x256xf32> to vector<8x256xf32>
    %100 = arith.truncf %98 : vector<8x64xf32> to vector<8x64xbf16>
    %cst_24 = arith.constant dense<0.000000e+00> : vector<8x256xf32>
    %101 = tpu.matmul %100, %16, %cst_24 {dimension_numbers = #tpu.dot_dimension_numbers<[1], [0], [0], [1], [0, 0, 1, 1], [], []>} : vector<8x64xbf16>, vector<64x256xbf16>, vector<8x256xf32> -> vector<8x256xf32>
    %102 = arith.addf %99, %101 : vector<8x256xf32>
    %103 = vector.extract_strided_slice %102 {offsets = [0, 0], sizes = [8, 192], strides = [1, 1]} : vector<8x256xf32> to vector<8x192xf32>
    %104 = arith.negf %103 : vector<8x192xf32>
    %105 = math.exp %104 : vector<8x192xf32>
    %cst_25 = arith.constant 1.000000e+00 : f32
    %106 = vector.broadcast %cst_25 : f32 to vector<8x192xf32>
    %107 = arith.addf %106, %105 : vector<8x192xf32>
    %108 = arith.divf %106, %107 : vector<8x192xf32>
    %109 = vector.extract_strided_slice %102 {offsets = [0, 192], sizes = [8, 64], strides = [1, 1]} : vector<8x256xf32> to vector<8x64xf32>
    %110 = math.tanh %109 : vector<8x64xf32>
    %111 = vector.extract_strided_slice %108 {offsets = [0, 0], sizes = [8, 64], strides = [1, 1]} : vector<8x192xf32> to vector<8x64xf32>
    %112 = vector.extract_strided_slice %108 {offsets = [0, 64], sizes = [8, 64], strides = [1, 1]} : vector<8x192xf32> to vector<8x64xf32>
    %113 = vector.extract_strided_slice %108 {offsets = [0, 128], sizes = [8, 64], strides = [1, 1]} : vector<8x192xf32> to vector<8x64xf32>
    %114 = arith.mulf %112, %96 : vector<8x64xf32>
    %115 = arith.mulf %111, %110 : vector<8x64xf32>
    %116 = arith.addf %114, %115 : vector<8x64xf32>
    %117 = math.tanh %116 : vector<8x64xf32>
    %118 = arith.mulf %113, %117 : vector<8x64xf32>
    %119 = vector.extract_strided_slice %15 {offsets = [40, 0], sizes = [8, 256], strides = [1, 1]} : vector<64x256xf32> to vector<8x256xf32>
    %120 = arith.truncf %118 : vector<8x64xf32> to vector<8x64xbf16>
    %cst_26 = arith.constant dense<0.000000e+00> : vector<8x256xf32>
    %121 = tpu.matmul %120, %16, %cst_26 {dimension_numbers = #tpu.dot_dimension_numbers<[1], [0], [0], [1], [0, 0, 1, 1], [], []>} : vector<8x64xbf16>, vector<64x256xbf16>, vector<8x256xf32> -> vector<8x256xf32>
    %122 = arith.addf %119, %121 : vector<8x256xf32>
    %123 = vector.extract_strided_slice %122 {offsets = [0, 0], sizes = [8, 192], strides = [1, 1]} : vector<8x256xf32> to vector<8x192xf32>
    %124 = arith.negf %123 : vector<8x192xf32>
    %125 = math.exp %124 : vector<8x192xf32>
    %cst_27 = arith.constant 1.000000e+00 : f32
    %126 = vector.broadcast %cst_27 : f32 to vector<8x192xf32>
    %127 = arith.addf %126, %125 : vector<8x192xf32>
    %128 = arith.divf %126, %127 : vector<8x192xf32>
    %129 = vector.extract_strided_slice %122 {offsets = [0, 192], sizes = [8, 64], strides = [1, 1]} : vector<8x256xf32> to vector<8x64xf32>
    %130 = math.tanh %129 : vector<8x64xf32>
    %131 = vector.extract_strided_slice %128 {offsets = [0, 0], sizes = [8, 64], strides = [1, 1]} : vector<8x192xf32> to vector<8x64xf32>
    %132 = vector.extract_strided_slice %128 {offsets = [0, 64], sizes = [8, 64], strides = [1, 1]} : vector<8x192xf32> to vector<8x64xf32>
    %133 = vector.extract_strided_slice %128 {offsets = [0, 128], sizes = [8, 64], strides = [1, 1]} : vector<8x192xf32> to vector<8x64xf32>
    %134 = arith.mulf %132, %116 : vector<8x64xf32>
    %135 = arith.mulf %131, %130 : vector<8x64xf32>
    %136 = arith.addf %134, %135 : vector<8x64xf32>
    %137 = math.tanh %136 : vector<8x64xf32>
    %138 = arith.mulf %133, %137 : vector<8x64xf32>
    %139 = vector.extract_strided_slice %15 {offsets = [48, 0], sizes = [8, 256], strides = [1, 1]} : vector<64x256xf32> to vector<8x256xf32>
    %140 = arith.truncf %138 : vector<8x64xf32> to vector<8x64xbf16>
    %cst_28 = arith.constant dense<0.000000e+00> : vector<8x256xf32>
    %141 = tpu.matmul %140, %16, %cst_28 {dimension_numbers = #tpu.dot_dimension_numbers<[1], [0], [0], [1], [0, 0, 1, 1], [], []>} : vector<8x64xbf16>, vector<64x256xbf16>, vector<8x256xf32> -> vector<8x256xf32>
    %142 = arith.addf %139, %141 : vector<8x256xf32>
    %143 = vector.extract_strided_slice %142 {offsets = [0, 0], sizes = [8, 192], strides = [1, 1]} : vector<8x256xf32> to vector<8x192xf32>
    %144 = arith.negf %143 : vector<8x192xf32>
    %145 = math.exp %144 : vector<8x192xf32>
    %cst_29 = arith.constant 1.000000e+00 : f32
    %146 = vector.broadcast %cst_29 : f32 to vector<8x192xf32>
    %147 = arith.addf %146, %145 : vector<8x192xf32>
    %148 = arith.divf %146, %147 : vector<8x192xf32>
    %149 = vector.extract_strided_slice %142 {offsets = [0, 192], sizes = [8, 64], strides = [1, 1]} : vector<8x256xf32> to vector<8x64xf32>
    %150 = math.tanh %149 : vector<8x64xf32>
    %151 = vector.extract_strided_slice %148 {offsets = [0, 0], sizes = [8, 64], strides = [1, 1]} : vector<8x192xf32> to vector<8x64xf32>
    %152 = vector.extract_strided_slice %148 {offsets = [0, 64], sizes = [8, 64], strides = [1, 1]} : vector<8x192xf32> to vector<8x64xf32>
    %153 = vector.extract_strided_slice %148 {offsets = [0, 128], sizes = [8, 64], strides = [1, 1]} : vector<8x192xf32> to vector<8x64xf32>
    %154 = arith.mulf %152, %136 : vector<8x64xf32>
    %155 = arith.mulf %151, %150 : vector<8x64xf32>
    %156 = arith.addf %154, %155 : vector<8x64xf32>
    %157 = math.tanh %156 : vector<8x64xf32>
    %158 = arith.mulf %153, %157 : vector<8x64xf32>
    %159 = vector.extract_strided_slice %15 {offsets = [56, 0], sizes = [8, 256], strides = [1, 1]} : vector<64x256xf32> to vector<8x256xf32>
    %160 = arith.truncf %158 : vector<8x64xf32> to vector<8x64xbf16>
    %cst_30 = arith.constant dense<0.000000e+00> : vector<8x256xf32>
    %161 = tpu.matmul %160, %16, %cst_30 {dimension_numbers = #tpu.dot_dimension_numbers<[1], [0], [0], [1], [0, 0, 1, 1], [], []>} : vector<8x64xbf16>, vector<64x256xbf16>, vector<8x256xf32> -> vector<8x256xf32>
    %162 = arith.addf %159, %161 : vector<8x256xf32>
    %163 = vector.extract_strided_slice %162 {offsets = [0, 0], sizes = [8, 192], strides = [1, 1]} : vector<8x256xf32> to vector<8x192xf32>
    %164 = arith.negf %163 : vector<8x192xf32>
    %165 = math.exp %164 : vector<8x192xf32>
    %cst_31 = arith.constant 1.000000e+00 : f32
    %166 = vector.broadcast %cst_31 : f32 to vector<8x192xf32>
    %167 = arith.addf %166, %165 : vector<8x192xf32>
    %168 = arith.divf %166, %167 : vector<8x192xf32>
    %169 = vector.extract_strided_slice %162 {offsets = [0, 192], sizes = [8, 64], strides = [1, 1]} : vector<8x256xf32> to vector<8x64xf32>
    %170 = math.tanh %169 : vector<8x64xf32>
    %171 = vector.extract_strided_slice %168 {offsets = [0, 0], sizes = [8, 64], strides = [1, 1]} : vector<8x192xf32> to vector<8x64xf32>
    %172 = vector.extract_strided_slice %168 {offsets = [0, 64], sizes = [8, 64], strides = [1, 1]} : vector<8x192xf32> to vector<8x64xf32>
    %173 = vector.extract_strided_slice %168 {offsets = [0, 128], sizes = [8, 64], strides = [1, 1]} : vector<8x192xf32> to vector<8x64xf32>
    %174 = arith.mulf %172, %156 : vector<8x64xf32>
    %175 = arith.mulf %171, %170 : vector<8x64xf32>
    %176 = arith.addf %174, %175 : vector<8x64xf32>
    %177 = math.tanh %176 : vector<8x64xf32>
    %178 = arith.mulf %173, %177 : vector<8x64xf32>
    %179 = arith.truncf %178 : vector<8x64xf32> to vector<8x64xbf16>
    %c0_32 = arith.constant 0 : index
    %c0_33 = arith.constant 0 : index
    %180 = vector.load %arg7[%c0_32, %c0_33] : memref<64x32xbf16, #tpu.memory_space<vmem>>, vector<64x32xbf16>
    %cst_34 = arith.constant dense<0.000000e+00> : vector<8x32xf32>
    %181 = tpu.matmul %179, %180, %cst_34 {dimension_numbers = #tpu.dot_dimension_numbers<[1], [0], [0], [1], [0, 0, 1, 1], [], []>} : vector<8x64xbf16>, vector<64x32xbf16>, vector<8x32xf32> -> vector<8x32xf32>
    %c0_35 = arith.constant 0 : index
    %c0_36 = arith.constant 0 : index
    %182 = vector.load %arg8[%c0_35, %c0_36] : memref<1x32xf32, #tpu.memory_space<vmem>>, vector<1x32xf32>
    %183 = vector.broadcast %182 : vector<1x32xf32> to vector<8x32xf32>
    %184 = arith.addf %181, %183 : vector<8x32xf32>
    %cst_37 = arith.constant 0.000000e+00 : f32
    %185 = vector.broadcast %cst_37 : f32 to vector<8x32xf32>
    %186 = arith.maximumf %184, %185 : vector<8x32xf32>
    %187 = arith.truncf %186 : vector<8x32xf32> to vector<8x32xbf16>
    %c0_38 = arith.constant 0 : index
    %c0_39 = arith.constant 0 : index
    %188 = vector.load %arg9[%c0_38, %c0_39] : memref<32x1xbf16, #tpu.memory_space<vmem>>, vector<32x1xbf16>
    %cst_40 = arith.constant dense<0.000000e+00> : vector<8x1xf32>
    %189 = tpu.matmul %187, %188, %cst_40 {dimension_numbers = #tpu.dot_dimension_numbers<[1], [0], [0], [1], [0, 0, 1, 1], [], []>} : vector<8x32xbf16>, vector<32x1xbf16>, vector<8x1xf32> -> vector<8x1xf32>
    %c0_41 = arith.constant 0 : index
    %c0_42 = arith.constant 0 : index
    %190 = vector.load %arg10[%c0_41, %c0_42] : memref<1x1xf32, #tpu.memory_space<vmem>>, vector<1x1xf32>
    %191 = vector.broadcast %190 : vector<1x1xf32> to vector<8x1xf32>
    %192 = arith.addf %189, %191 : vector<8x1xf32>
    %cst_43 = arith.constant 0.000000e+00 : f32
    %193 = vector.broadcast %cst_43 : f32 to vector<8x1xf32>
    %194 = arith.maximumf %192, %193 : vector<8x1xf32>
    %195 = vector.extract_strided_slice %194 {offsets = [0, 0], sizes = [4, 1], strides = [1, 1]} : vector<8x1xf32> to vector<4x1xf32>
    %c0_44 = arith.constant 0 : index
    %c0_45 = arith.constant 0 : index
    %196 = vector.load %arg11[%c0_44, %c0_45] : memref<4x1xf32, #tpu.memory_space<vmem>>, vector<4x1xf32>
    tpu.vector_store %arg11[%c0_44, %c0_45], %195 {strides = array<i32>} : memref<4x1xf32, #tpu.memory_space<vmem>>, vector<4x1xf32>,
    return
  }
}

</mosaic_0001>

<bundles_post_ra>
// kernel: dual_lstm_forward.1
= control target key start
LH: loop header
LB: loop body
LE: loop exit
PB: predicated region body
PF: predicated region fallthrough
CT: control target
= control target key end

     0   :  { %vm104_vm0 = vcmask 1041408   ;;  %vm105_vm1 = vcmask 1042432   ;;  %v1327_v1 = vmov 65535   ;;  %v1328_v3 = vmov 0   ;;  %s1329_s12 = smov 64   ;;  %s1674_s4 = inlined_call_operand.vmem [shape: bf16[5,256], index: 4, kind: input, shape index: {}]   ;;  %s1675_s1 = inlined_call_operand.vmem [shape: f32[32,5], index: 1, kind: input, shape index: {}]   ;;  %s1676_s0 = inlined_call_operand.vmem [shape: f32[32,1], index: 0, kind: input, shape index: {}]   ;;  %s1677_s6 = inlined_call_operand.vmem [shape: f32[1,256], index: 6, kind: input, shape index: {}]   ;;  %s1678_s5 = inlined_call_operand.vmem [shape: bf16[64,256], index: 5, kind: input, shape index: {}]   ;;  %s1679_s2 = inlined_call_operand.vmem [shape: bf16[64,32], index: 2, kind: input, shape index: {}]   ;;  %s1680_s3 = inlined_call_operand.vmem [shape: f32[1,256], index: 3, kind: input, shape index: {}]   ;;  %s1681_s7 = inlined_call_operand.vmem [shape: bf16[64,32], index: 7, kind: input, shape index: {}]   ;;  %s1682_s9 = inlined_call_operand.vmem [shape: bf16[32,1], index: 9, kind: input, shape index: {}]   ;;  %s1683_s10 = inlined_call_operand.<no memory space> [shape: f32[1,1], index: 10, kind: input, shape index: {}]   ;;  %s1684_s8 = inlined_call_operand.vmem [shape: f32[1,32], index: 8, kind: input, shape index: {}]   ;;  %s1685_s11 = inlined_call_operand.vmem [shape: f32[4,1], index: 11, kind: output, shape index: {}]  }
   0x1   :  { %v47_v0 = vld [vmem:[%s1674_s4] sm:$0x77]  ;;  %v106_v2 = vsel %vm104_vm0, 4294967295, %v1327_v1  ;;  %146 = vmatprep.mubr.bf16.mxu0 %v1328_v3  ;;  %1206 = vset.pattern.permute.xlu1 %v1328_v3  ;;  %v74_v4 = vlaneseq  ;;  %v42_v10 = vld [vmem:[%s1675_s1 + $0x8] sm:$0xff]  ;;  %v50_v11 = vld [vmem:[%s1676_s0 + $0x10] sm:$0xff]  ;;  %vm97_vm2 = vcmask 39936  }
   0x2   :  { %v1120_v5 = vcombine.high %v47_v0, %v47_v0  ;;  %v107_v6 = vsel %vm105_vm1, %v106_v2, 0  ;;  %v1119_v7 = vcombine.low %v47_v0, %v47_v0  ;;  %v48_v8 = vld [vmem:[%s1676_s0] sm:$0xff]  ;;  %1205 = vset.pattern.permute.xlu0 %v1328_v3  ;;  %256 = vmatprep.mubr.bf16.mxu1 %v1328_v3  ;;  %v49_v15 = vld [vmem:[%s1676_s0 + $0x8] sm:$0xff]  ;;  %v51_v17 = vld [vmem:[%s1676_s0 + $0x18] sm:$0xff]  ;;  %vm211_vm3 = vcmask 261120  }
   0x3   :  { %v41_v9 = vld [vmem:[%s1675_s1] sm:$0xff]  ;;  %55 = vperm.xlu1 %1206, %v48_v8   ;;  %v1411_v12 = vshrl.u32 %v74_v4, 7  ;;  %65 = vperm.xlu0 %1205, %v50_v11   ;;  %v43_v21 = vld [vmem:[%s1675_s1 + $0x10] sm:$0xff]  ;;  %v44_v22 = vld [vmem:[%s1675_s1 + $0x18] sm:$0xff]  ;;  %vm345_vm4 = vcmask 523264   ;;  %vm1331_vm5 = vmmov 0  }
   0x4   :  { %v112_v13 = vand.u32 %v1120_v5, %v107_v6  ;;  %v109_v14 = vand.u32 %v1119_v7, %v107_v6  ;;  %v1419_v16 = vld [vmem:[%s1677_s6] sm:$0x3]  ;;  %v45_v19 = vpack.c.bf16 %v42_v10, %v41_v9  ;;  %v46_v23 = vpack.c.bf16 %v44_v22, %v43_v21  ;;  %v1439_v24 = vld [vmem:[%s1678_s5 + $0x34] ss:$8 sps:$4 sm:$0xff]   ;;  %v1444_v25 = vld [vmem:[%s1678_s5 + $0x30] ss:$8 sps:$4 sm:$0xff]  }
   0x5   :  { %v76_v18 = vsub.s32 0, %v1411_v12  ;;  %v1451_v26 = vld [vmem:[%s1678_s5 + $0x24] ss:$8 sps:$4 sm:$0xff]   ;;  %v1456_v27 = vld [vmem:[%s1678_s5 + $0x20] ss:$8 sps:$4 sm:$0xff]   ;;  %v80_v37 = vsub.s32 1, %v1411_v12 }
   0x6   :  { %128 = vmatprep.subr.bf16.mxu0 %v112_v13  ;;  %v1463_v28 = vld [vmem:[%s1678_s5 + $0x14] ss:$8 sps:$4 sm:$0xff]   ;;  %v1468_v29 = vld [vmem:[%s1678_s5 + $0x10] ss:$8 sps:$4 sm:$0xff]   ;;  %v1475_v30 = vld [vmem:[%s1678_s5 + $0x4] ss:$8 sps:$4 sm:$0xff]  }
   0x7   :  { %129 = vmatpush1.bf16.msra.mxu0 %v109_v14  ;;  %60 = vperm.xlu1 %1206, %v49_v15   ;;  %v1426_v20 = vrot.slane %v1419_v16, %v76_v18  ;;  %v1480_v31 = vld [vmem:[%s1678_s5] ss:$8 sps:$4 sm:$0xff]   ;;  %v1514_v10 = vrot.slane %v1419_v16, %v80_v37  ;;  %vm1113_vm6 = vcmask 3072  }
   0x8   :  { %70 = vperm.xlu0 %1205, %v51_v17   ;;  %357 = vmatprep.subr.bf16.mxu0 %v1439_v24  ;;  %v52_v39 = vld [vmem:[%s1680_s3] sm:$0x3] }
   0x9   :  { %v81_v41 = vrot.slane %v52_v39, %v80_v37  ;;  %v77_v43 = vrot.slane %v52_v39, %v76_v18  ;;  %v1221_v5 = vld [vmem:[%s1679_s2] sm:$0xff]  }
   0xa   :  { %1121 = vmatmul.mubr.msk.bf16.vlgmr.msra.gmra.mxu0 %vm97_vm2, %v45_v19 }
   0xb   :  { %156 = vmatprep.mubr.bf16.mxu0 %v1328_v3  ;;  %358 = vmatpush1.bf16.msra.mxu0 %v1444_v25 }
   0xc   :  { %359 = vmatprep.subr.bf16.mxu0 %v1451_v26 }
   0xf   :  { %360 = vmatpush1.bf16.msra.mxu0 %v1456_v27 }
  0x10   :  { %361 = vmatprep.subr.bf16.mxu0 %v1463_v28 }
  0x12   :  { %1122 = vmatmul.mubr.msk.bf16.gmra.mxu0 %vm97_vm2, %v46_v23 }
  0x13   :  { %381 = vmatprep.mubr.bf16.mxu0 %v1328_v3  ;;  %362 = vmatpush1.bf16.msra.mxu0 %v1468_v29 }
  0x14   :  { %363 = vmatprep.subr.bf16.mxu0 %v1475_v30 }
  0x17   :  { %364 = vmatpush1.bf16.msra.mxu0 %v1480_v31 }
  0x18   :  { %434 = vmatprep.subr.bf16.mxu0 %v1439_v24 }
  0x1a   :  { %382 = vmatmul.mubr.bf16.vlgmr.msra.gmra.mxu0 %v1328_v3 }
  0x1b   :  { %435 = vmatpush1.bf16.msra.mxu0 %v1444_v25  ;;  %458 = vmatprep.mubr.bf16.mxu0 %v1328_v3 }
  0x1c   :  { %436 = vmatprep.subr.bf16.mxu0 %v1451_v26 }
  0x1f   :  { %437 = vmatpush1.bf16.msra.mxu0 %v1456_v27 }
  0x20   :  { %438 = vmatprep.subr.bf16.mxu0 %v1463_v28 }
  0x23   :  { %439 = vmatpush1.bf16.msra.mxu0 %v1468_v29 }
  0x24   :  { %440 = vmatprep.subr.bf16.mxu0 %v1475_v30 }
  0x27   :  { %441 = vmatpush1.bf16.msra.mxu0 %v1480_v31 }
  0x28   :  { %588 = vmatprep.subr.bf16.mxu0 %v1439_v24 }
  0x7e   :  { %v66_v34 = vpop.permute.xlu0 %65  ;;  %v56_v35 = vpop.permute.xlu1 %55 }
  0x7f   :  { %v89_v47 = vmul.f32 %v81_v41, %v66_v34  ;;  %v88_v48 = vmul.f32 %v77_v43, %v66_v34  ;;  %v85_v51 = vmul.f32 %v81_v41, %v56_v35  ;;  %v84_v59 = vmul.f32 %v77_v43, %v56_v35 }
  0x82   :  { %v61_v44 = vpop.permute.xlu1 %60 }
  0x83   :  { %v71_v42 = vpop.permute.xlu0 %70  ;;  %v87_v46 = vmul.f32 %v81_v41, %v61_v44  ;;  %v86_v53 = vmul.f32 %v77_v43, %v61_v44 }
  0x84   :  { %v90_v49 = vmul.f32 %v77_v43, %v71_v42  ;;  %v91_v52 = vmul.f32 %v81_v41, %v71_v42 }
  0xca   :  { %v148_v32 = vpop.f32.mrf.mxu0 }
  0xcb   :  { %v149_v2 = vadd.f32 %v148_v32, %v84_v59 }
  0xcc   :  { %v150_v33 = vpop.f32.mrf.mxu0 }
  0xcd   :  { %v151_v61 = vadd.f32 %v150_v33, %v85_v51 }
  0xce   :  { %v152_v36 = vpop.f32.mrf.mxu0 }
  0xcf   :  { %v153_v63 = vadd.f32 %v152_v36, %v86_v53 }
  0xd0   :  { %v154_v38 = vpop.f32.mrf.mxu0 }
  0xd1   :  { %v155_v56 = vadd.f32 %v154_v38, %v87_v46  ;;  %v175_v4 = vpack.c.bf16 %v153_v63, %v149_v2  ;;  %v1224_v63 = vld [vmem:[%s1679_s2 + $0x18] sm:$0xff]  }
  0xd2   :  { %v158_v40 = vpop.f32.mrf.mxu0 }
  0xd3   :  { %v159_v60 = vadd.f32 %v158_v40, %v88_v48  ;;  %v176_v1 = vpack.c.bf16 %v155_v56, %v151_v61  ;;  %v1222_v61 = vld [vmem:[%s1679_s2 + $0x8] sm:$0xff]  }
  0xd4   :  { %v160_v45 = vpop.f32.mrf.mxu0 }
  0xd5   :  { %v161_v57 = vadd.f32 %v160_v45, %v89_v47 }
  0xd6   :  { %v162_v50 = vpop.f32.mrf.mxu0 }
  0xd7   :  { %v163_v54 = vadd.f32 %v162_v50, %v90_v49 }
  0xd8   :  { %v164_v55 = vpop.f32.mrf.mxu0 }
  0xd9   :  { %v165_v58 = vadd.f32 %v164_v55, %v91_v52  ;;  %v177_v0 = vpack.c.bf16 %v163_v54, %v159_v60 }
  0xda   :  { %v383_v6 = vpop.f32.mrf.mxu0 }
  0xdb   :  { %v178_v62 = vpack.c.bf16 %v165_v58, %v161_v57 }
  0xdc   :  { %v385_v7 = vpop.f32.mrf.mxu0 }
  0xdd   :  { %236 = vmatprep.subr.bf16.mxu1 %v178_v62  ;;  %v1223_v62 = vld [vmem:[%s1679_s2 + $0x10] sm:$0xff]  }
  0xde   :  { %237 = vmatpush1.bf16.msra.mxu1 %v177_v0  ;;  %v387_v8 = vpop.f32.mrf.mxu0 }
  0xdf   :  { %238 = vmatprep.subr.bf16.mxu1 %v176_v1 }
  0xe0   :  { %v388_v9 = vpop.f32.mrf.mxu0 }
  0xe2   :  { %239 = vmatpush1.bf16.msra.mxu1 %v175_v4 }
  0xe3   :  { %511 = vmatprep.subr.bf16.mxu1 %v1439_v24 }
  0xe5   :  { %1127 = vmatmul.mubr.msk.bf16.vlgmr.msra.gmra.mxu1 %vm211_vm3, %v1221_v5 }
  0xe6   :  { %512 = vmatpush1.bf16.msra.mxu1 %v1444_v25  ;;  %266 = vmatprep.mubr.bf16.mxu1 %v1328_v3 }
  0xe7   :  { %513 = vmatprep.subr.bf16.mxu1 %v1451_v26 }
  0xea   :  { %514 = vmatpush1.bf16.msra.mxu1 %v1456_v27 }
  0xeb   :  { %515 = vmatprep.subr.bf16.mxu1 %v1463_v28 }
  0xed   :  { %1128 = vmatmul.mubr.msk.bf16.gmra.mxu1 %vm211_vm3, %v1222_v61 }
  0xee   :  { %516 = vmatpush1.bf16.msra.mxu1 %v1468_v29  ;;  %276 = vmatprep.mubr.bf16.mxu1 %v1328_v3 }
  0xef   :  { %517 = vmatprep.subr.bf16.mxu1 %v1475_v30 }
  0xf2   :  { %518 = vmatpush1.bf16.msra.mxu1 %v1480_v31 }
  0xf3   :  { %665 = vmatprep.subr.bf16.mxu1 %v1439_v24 }
  0xf5   :  { %1129 = vmatmul.mubr.msk.bf16.gmra.mxu1 %vm211_vm3, %v1223_v62 }
  0xf6   :  { %286 = vmatprep.mubr.bf16.mxu1 %v1328_v3 }
  0xfd   :  { %1130 = vmatmul.mubr.msk.bf16.gmra.mxu1 %vm211_vm3, %v1224_v63 }
  0xfe   :  { %535 = vmatprep.mubr.bf16.mxu1 %v1328_v3 }
 0x1a5   :  { %v258_v11 = vpop.f32.mrf.mxu1 }
 0x1a6   :  { %v259_v17 = vadd.f32 %v258_v11, %v1426_v20 }
 0x1a7   :  { %v260_v12 = vpop.f32.mrf.mxu1 }
 0x1a8   :  { %v261_v13 = vadd.f32 %v260_v12, %v1514_v10  ;;  %v390_v18 = vadd.f32 %v383_v6, %v259_v17 }
 0x1a9   :  { %v262_v44 = vpop.f32.mrf.mxu1 }
 0x1aa   :  { %v391_v14 = vadd.f32 %v385_v7, %v261_v13  ;;  %v1139_v19 = vmul.f32 -1.442695, %v390_v18  ;;  %v263_v46 = vadd.f32 %v262_v44, %v1426_v20 }
 0x1ab   :  { %v264_v45 = vpop.f32.mrf.mxu1 }
 0x1ac   :  { %1231 = vtanh.f32 %v391_v14  ;;  %v1140_v37 = vmul.f32 -1.442695, %v391_v14  ;;  %v265_v48 = vadd.f32 %v264_v45, %v1514_v10 }
 0x1ad   :  { %1233 = vpow2.f32 %v1139_v19  ;;  %v268_v13 = vpop.f32.mrf.mxu1 }
 0x1af   :  { %v270_v14 = vpop.f32.mrf.mxu1 }
 0x1b9   :  { %v1232_v15 = vpop.eup %1231 }
 0x1ba   :  { %407 = vrot.lane.b32.xlu0 %v1232_v15, %s1329_s12  ;;  %v1234_v21 = vpop.eup %1233  ;;  %v272_v15 = vpop.f32.mrf.mxu1 }
 0x1bb   :  { %v398_v22 = vadd.f32 1.0, %v1234_v21 }
 0x1bc   :  { %v274_v17 = vpop.f32.mrf.mxu1 }
 0x1bd   :  { %1235 = vrcp.f32 %v398_v22  ;;  %v275_v62 = vadd.f32 %v274_v17, %v1514_v10 }
 0x1be   :  { %v1561_v18 = vpop.f32.mrf.mxu1 }
 0x1c0   :  { %v1563_v19 = vpop.f32.mrf.mxu1 }
 0x1c2   :  { %v1565_v21 = vpop.f32.mrf.mxu1 }
 0x1c4   :  { %v1567_v22 = vpop.f32.mrf.mxu1 }
 0x1ca   :  { %v1236_v16 = vpop.eup %1235 }
 0x1cb   :  { %v405_v33 = vmul.f32 0.0, %v1236_v16 }
 0x22c   :  { %v408_v23 = vpop.permute.xlu0 %407 }
 0x22d   :  { %v410_v32 = vmul.f32 %v1236_v16, %v408_v23  ;;  %v1569_v16 = vpop.f32.mrf.mxu1 }
 0x22f   :  { %412 = vrot.lane.b32.xlu1 %v410_v32, %s1329_s12  ;;  %v1571_v23 = vpop.f32.mrf.mxu1 }
 0x231   :  { %v1573_v32 = vpop.f32.mrf.mxu1 }
 0x2a1   :  { %v413_v34 = vpop.permute.xlu1 %412 }
 0x2a2   :  { %v415_v35 = vadd.f32 %v413_v34, %v405_v33  ;;  %v1575_v33 = vpop.f32.mrf.mxu1  ;;  %v269_v34 = vadd.f32 %v268_v13, %v1426_v20 }
 0x2a4   :  { %1237 = vtanh.f32 %v415_v35 }
 0x2a5   :  { %1239 = vpow2.f32 %v1140_v37 }
 0x2b1   :  { %v1238_v36 = vpop.eup %1237 }
 0x2b2   :  { %418 = vrot.lane.b32.xlu0 %v1238_v36, %s1329_s12  ;;  %v1240_v38 = vpop.eup %1239  ;;  %v271_v36 = vadd.f32 %v270_v14, %v1514_v10 }
 0x2b3   :  { %v399_v39 = vadd.f32 1.0, %v1240_v38 }
 0x2b5   :  { %1241 = vrcp.f32 %v399_v39 }
 0x2c2   :  { %v1242_v40 = vpop.eup %1241 }
 0x324   :  { %v419_v41 = vpop.permute.xlu0 %418 }
 0x325   :  { %v421_v42 = vmul.f32 %v1242_v40, %v419_v41 }
 0x327   :  { %v422_v43 = vpack.c.bf16 %v421_v42, %v421_v42 }
 0x329   :  { %1141 = vmatmul.mubr.msk.bf16.vlgmr.msra.gmra.mxu0 %vm345_vm4, %v422_v43 }
 0x32a   :  { %589 = vmatpush1.bf16.msra.mxu0 %v1444_v25  ;;  %612 = vmatprep.mubr.bf16.mxu0 %v1328_v3 }
 0x32b   :  { %590 = vmatprep.subr.bf16.mxu0 %v1451_v26 }
 0x32e   :  { %591 = vmatpush1.bf16.msra.mxu0 %v1456_v27 }
 0x32f   :  { %592 = vmatprep.subr.bf16.mxu0 %v1463_v28 }
 0x332   :  { %593 = vmatpush1.bf16.msra.mxu0 %v1468_v29 }
 0x333   :  { %594 = vmatprep.subr.bf16.mxu0 %v1475_v30 }
 0x336   :  { %595 = vmatpush1.bf16.msra.mxu0 %v1480_v31 }
 0x337   :  { %742 = vmatprep.subr.bf16.mxu0 %v1439_v24 }
 0x3e9   :  { %v460_v47 = vpop.f32.mrf.mxu0 }
 0x3ea   :  { %v467_v49 = vadd.f32 %v460_v47, %v263_v46 }
 0x3eb   :  { %v462_v50 = vpop.f32.mrf.mxu0 }
 0x3ec   :  { %v468_v51 = vadd.f32 %v462_v50, %v265_v48  ;;  %v1142_v55 = vmul.f32 -1.442695, %v467_v49 }
 0x3ed   :  { %v464_v52 = vpop.f32.mrf.mxu0 }
 0x3ee   :  { %1243 = vtanh.f32 %v468_v51  ;;  %v1143_v5 = vmul.f32 -1.442695, %v468_v51 }
 0x3ef   :  { %v465_v53 = vpop.f32.mrf.mxu0  ;;  %1245 = vpow2.f32 %v1142_v55 }
 0x3fb   :  { %v1244_v54 = vpop.eup %1243 }
 0x3fc   :  { %484 = vrot.lane.b32.xlu1 %v1244_v54, %s1329_s12  ;;  %v1246_v56 = vpop.eup %1245 }
 0x3fd   :  { %v475_v57 = vadd.f32 1.0, %v1246_v56 }
 0x3ff   :  { %1247 = vrcp.f32 %v475_v57 }
 0x40c   :  { %v1248_v58 = vpop.eup %1247 }
 0x40d   :  { %v482_v0 = vmul.f32 %v1248_v58, %v415_v35 }
 0x46e   :  { %v485_v59 = vpop.permute.xlu1 %484 }
 0x46f   :  { %v487_v60 = vmul.f32 %v1248_v58, %v485_v59 }
 0x471   :  { %489 = vrot.lane.b32.xlu0 %v487_v60, %s1329_s12  ;;  %v273_v60 = vadd.f32 %v272_v15, %v1426_v20 }
 0x4e3   :  { %v490_v1 = vpop.permute.xlu0 %489 }
 0x4e4   :  { %v492_v2 = vadd.f32 %v490_v1, %v482_v0 }
 0x4e6   :  { %1249 = vtanh.f32 %v492_v2 }
 0x4e7   :  { %1251 = vpow2.f32 %v1143_v5 }
 0x4f3   :  { %v1250_v4 = vpop.eup %1249 }
 0x4f4   :  { %495 = vrot.lane.b32.xlu1 %v1250_v4, %s1329_s12  ;;  %v1252_v6 = vpop.eup %1251 }
 0x4f5   :  { %v476_v7 = vadd.f32 1.0, %v1252_v6 }
 0x4f7   :  { %1253 = vrcp.f32 %v476_v7 }
 0x504   :  { %v1254_v8 = vpop.eup %1253 }
 0x566   :  { %v496_v9 = vpop.permute.xlu1 %495 }
 0x567   :  { %v498_v11 = vmul.f32 %v1254_v8, %v496_v9 }
 0x569   :  { %v499_v12 = vpack.c.bf16 %v498_v11, %v498_v11 }
 0x56b   :  { %1144 = vmatmul.mubr.msk.bf16.vlgmr.msra.gmra.mxu1 %vm345_vm4, %v499_v12 }
 0x56c   :  { %666 = vmatpush1.bf16.msra.mxu1 %v1444_v25  ;;  %689 = vmatprep.mubr.bf16.mxu1 %v1328_v3 }
 0x56d   :  { %667 = vmatprep.subr.bf16.mxu1 %v1451_v26 }
 0x570   :  { %668 = vmatpush1.bf16.msra.mxu1 %v1456_v27 }
 0x571   :  { %669 = vmatprep.subr.bf16.mxu1 %v1463_v28 }
 0x574   :  { %670 = vmatpush1.bf16.msra.mxu1 %v1468_v29 }
 0x575   :  { %671 = vmatprep.subr.bf16.mxu1 %v1475_v30 }
 0x578   :  { %672 = vmatpush1.bf16.msra.mxu1 %v1480_v31 }
 0x579   :  { %819 = vmatprep.subr.bf16.mxu1 %v1439_v24 }
 0x62b   :  { %v537_v35 = vpop.f32.mrf.mxu1 }
 0x62c   :  { %v544_v37 = vadd.f32 %v537_v35, %v269_v34 }
 0x62d   :  { %v539_v38 = vpop.f32.mrf.mxu1 }
 0x62e   :  { %v545_v39 = vadd.f32 %v539_v38, %v271_v36  ;;  %v1145_v43 = vmul.f32 -1.442695, %v544_v37 }
 0x62f   :  { %v541_v40 = vpop.f32.mrf.mxu1 }
 0x630   :  { %1255 = vtanh.f32 %v545_v39  ;;  %v1146_v53 = vmul.f32 -1.442695, %v545_v39  ;;  %v279_v40 = vadd.f32 %v1561_v18, %v1426_v20 }
 0x631   :  { %v542_v41 = vpop.f32.mrf.mxu1  ;;  %1257 = vpow2.f32 %v1145_v43 }
 0x63d   :  { %v1256_v42 = vpop.eup %1255 }
 0x63e   :  { %561 = vrot.lane.b32.xlu0 %v1256_v42, %s1329_s12  ;;  %v1258_v44 = vpop.eup %1257  ;;  %v281_v42 = vadd.f32 %v1563_v19, %v1514_v10 }
 0x63f   :  { %v552_v45 = vadd.f32 1.0, %v1258_v44 }
 0x641   :  { %1259 = vrcp.f32 %v552_v45 }
 0x64e   :  { %v1260_v46 = vpop.eup %1259 }
 0x64f   :  { %v559_v49 = vmul.f32 %v1260_v46, %v492_v2 }
 0x6b0   :  { %v562_v47 = vpop.permute.xlu0 %561 }
 0x6b1   :  { %v564_v48 = vmul.f32 %v1260_v46, %v562_v47 }
 0x6b3   :  { %566 = vrot.lane.b32.xlu1 %v564_v48, %s1329_s12 }
 0x725   :  { %v567_v50 = vpop.permute.xlu1 %566 }
 0x726   :  { %v569_v51 = vadd.f32 %v567_v50, %v559_v49 }
 0x728   :  { %1261 = vtanh.f32 %v569_v51 }
 0x729   :  { %1263 = vpow2.f32 %v1146_v53 }
 0x735   :  { %v1262_v52 = vpop.eup %1261 }
 0x736   :  { %572 = vrot.lane.b32.xlu0 %v1262_v52, %s1329_s12  ;;  %v1264_v54 = vpop.eup %1263 }
 0x737   :  { %v553_v55 = vadd.f32 1.0, %v1264_v54 }
 0x739   :  { %1265 = vrcp.f32 %v553_v55 }
 0x746   :  { %v1266_v56 = vpop.eup %1265 }
 0x7a8   :  { %v573_v57 = vpop.permute.xlu0 %572 }
 0x7a9   :  { %v575_v58 = vmul.f32 %v1266_v56, %v573_v57 }
 0x7ab   :  { %v576_v59 = vpack.c.bf16 %v575_v58, %v575_v58 }
 0x7ad   :  { %1147 = vmatmul.mubr.msk.bf16.vlgmr.msra.gmra.mxu0 %vm345_vm4, %v576_v59 }
 0x7ae   :  { %743 = vmatpush1.bf16.msra.mxu0 %v1444_v25  ;;  %766 = vmatprep.mubr.bf16.mxu0 %v1328_v3 }
 0x7af   :  { %744 = vmatprep.subr.bf16.mxu0 %v1451_v26 }
 0x7b2   :  { %745 = vmatpush1.bf16.msra.mxu0 %v1456_v27 }
 0x7b3   :  { %746 = vmatprep.subr.bf16.mxu0 %v1463_v28 }
 0x7b6   :  { %747 = vmatpush1.bf16.msra.mxu0 %v1468_v29 }
 0x7b7   :  { %748 = vmatprep.subr.bf16.mxu0 %v1475_v30 }
 0x7ba   :  { %749 = vmatpush1.bf16.msra.mxu0 %v1480_v31 }
 0x7bb   :  { %896 = vmatprep.subr.bf16.mxu0 %v1439_v24 }
 0x86d   :  { %v614_v61 = vpop.f32.mrf.mxu0 }
 0x86e   :  { %v621_v63 = vadd.f32 %v614_v61, %v273_v60 }
 0x86f   :  { %v616_v0 = vpop.f32.mrf.mxu0 }
 0x870   :  { %v622_v1 = vadd.f32 %v616_v0, %v275_v62  ;;  %v1148_v6 = vmul.f32 -1.442695, %v621_v63  ;;  %v283_v0 = vadd.f32 %v1565_v21, %v1426_v20 }
 0x871   :  { %v618_v2 = vpop.f32.mrf.mxu0 }
 0x872   :  { %1267 = vtanh.f32 %v622_v1  ;;  %v1149_v17 = vmul.f32 -1.442695, %v622_v1 }
 0x873   :  { %v619_v4 = vpop.f32.mrf.mxu0  ;;  %1269 = vpow2.f32 %v1148_v6 }
 0x87f   :  { %v1268_v5 = vpop.eup %1267 }
 0x880   :  { %638 = vrot.lane.b32.xlu1 %v1268_v5, %s1329_s12  ;;  %v1270_v7 = vpop.eup %1269 }
 0x881   :  { %v629_v8 = vadd.f32 1.0, %v1270_v7 }
 0x883   :  { %1271 = vrcp.f32 %v629_v8 }
 0x890   :  { %v1272_v24 = vpop.eup %1271 }
 0x891   :  { %v636_v12 = vmul.f32 %v1272_v24, %v569_v51 }
 0x8f2   :  { %v639_v9 = vpop.permute.xlu1 %638 }
 0x8f3   :  { %v641_v11 = vmul.f32 %v1272_v24, %v639_v9 }
 0x8f5   :  { %643 = vrot.lane.b32.xlu0 %v641_v11, %s1329_s12 }
 0x967   :  { %v644_v13 = vpop.permute.xlu0 %643 }
 0x968   :  { %v646_v14 = vadd.f32 %v644_v13, %v636_v12 }
 0x96a   :  { %1273 = vtanh.f32 %v646_v14 }
 0x96b   :  { %1275 = vpow2.f32 %v1149_v17 }
 0x977   :  { %v1274_v15 = vpop.eup %1273 }
 0x978   :  { %649 = vrot.lane.b32.xlu1 %v1274_v15, %s1329_s12  ;;  %v1276_v34 = vpop.eup %1275 }
 0x979   :  { %v630_v35 = vadd.f32 1.0, %v1276_v34  ;;  %v289_v34 = vadd.f32 %v1569_v16, %v1426_v20 }
 0x97b   :  { %1277 = vrcp.f32 %v630_v35 }
 0x988   :  { %v1278_v36 = vpop.eup %1277 }
 0x9ea   :  { %v650_v37 = vpop.permute.xlu1 %649 }
 0x9eb   :  { %v652_v38 = vmul.f32 %v1278_v36, %v650_v37  ;;  %v291_v36 = vadd.f32 %v1571_v23, %v1514_v10 }
 0x9ed   :  { %v653_v39 = vpack.c.bf16 %v652_v38, %v652_v38 }
 0x9ef   :  { %1150 = vmatmul.mubr.msk.bf16.vlgmr.msra.gmra.mxu1 %vm345_vm4, %v653_v39 }
 0x9f0   :  { %820 = vmatpush1.bf16.msra.mxu1 %v1444_v25  ;;  %843 = vmatprep.mubr.bf16.mxu1 %v1328_v3 }
 0x9f1   :  { %821 = vmatprep.subr.bf16.mxu1 %v1451_v26 }
 0x9f4   :  { %822 = vmatpush1.bf16.msra.mxu1 %v1456_v27 }
 0x9f5   :  { %823 = vmatprep.subr.bf16.mxu1 %v1463_v28 }
 0x9f8   :  { %824 = vmatpush1.bf16.msra.mxu1 %v1468_v29 }
 0x9f9   :  { %825 = vmatprep.subr.bf16.mxu1 %v1475_v30 }
 0x9fc   :  { %826 = vmatpush1.bf16.msra.mxu1 %v1480_v31 }
 0xaaf   :  { %v691_v41 = vpop.f32.mrf.mxu1 }
 0xab0   :  { %v698_v43 = vadd.f32 %v691_v41, %v279_v40 }
 0xab1   :  { %v693_v44 = vpop.f32.mrf.mxu1 }
 0xab2   :  { %v699_v45 = vadd.f32 %v693_v44, %v281_v42  ;;  %v1151_v49 = vmul.f32 -1.442695, %v698_v43 }
 0xab3   :  { %v695_v46 = vpop.f32.mrf.mxu1 }
 0xab4   :  { %1279 = vtanh.f32 %v699_v45  ;;  %v1152_v57 = vmul.f32 -1.442695, %v699_v45 }
 0xab5   :  { %v696_v47 = vpop.f32.mrf.mxu1  ;;  %1281 = vpow2.f32 %v1151_v49 }
 0xac1   :  { %v1280_v48 = vpop.eup %1279 }
 0xac2   :  { %715 = vrot.lane.b32.xlu0 %v1280_v48, %s1329_s12  ;;  %v1282_v50 = vpop.eup %1281 }
 0xac3   :  { %v706_v51 = vadd.f32 1.0, %v1282_v50 }
 0xac5   :  { %1283 = vrcp.f32 %v706_v51 }
 0xad2   :  { %v1284_v52 = vpop.eup %1283 }
 0xad3   :  { %v713_v19 = vmul.f32 %v1284_v52, %v646_v14 }
 0xb34   :  { %v716_v18 = vpop.permute.xlu0 %715 }
 0xb35   :  { %v718_v53 = vmul.f32 %v1284_v52, %v716_v18 }
 0xb37   :  { %720 = vrot.lane.b32.xlu1 %v718_v53, %s1329_s12 }
 0xba9   :  { %v721_v54 = vpop.permute.xlu1 %720 }
 0xbaa   :  { %v723_v55 = vadd.f32 %v721_v54, %v713_v19 }
 0xbac   :  { %1285 = vtanh.f32 %v723_v55 }
 0xbad   :  { %1287 = vpow2.f32 %v1152_v57 }
 0xbb9   :  { %v1286_v56 = vpop.eup %1285 }
 0xbba   :  { %726 = vrot.lane.b32.xlu0 %v1286_v56, %s1329_s12  ;;  %v1288_v58 = vpop.eup %1287  ;;  %v293_v56 = vadd.f32 %v1573_v32, %v1426_v20 }
 0xbbb   :  { %v707_v59 = vadd.f32 1.0, %v1288_v58  ;;  %v295_v58 = vadd.f32 %v1575_v33, %v1514_v10  ;;  %v1225_v33 = vld [vmem:[%s1681_s7 + $0x18] sm:$0xff]  }
 0xbbd   :  { %1289 = vrcp.f32 %v707_v59 }
 0xbca   :  { %v1290_v60 = vpop.eup %1289 }
 0xc2c   :  { %v727_v61 = vpop.permute.xlu0 %726 }
 0xc2d   :  { %v729_v62 = vmul.f32 %v1290_v60, %v727_v61 }
 0xc2f   :  { %v730_v63 = vpack.c.bf16 %v729_v62, %v729_v62 }
 0xc31   :  { %1153 = vmatmul.mubr.msk.bf16.vlgmr.msra.gmra.mxu0 %vm345_vm4, %v730_v63 }
 0xc32   :  { %897 = vmatpush1.bf16.msra.mxu0 %v1444_v25  ;;  %920 = vmatprep.mubr.bf16.mxu0 %v1328_v3  ;;  %v285_v25 = vadd.f32 %v1567_v22, %v1514_v10  ;;  %v1330_v10 = vmov 0.0  }
 0xc33   :  { %898 = vmatprep.subr.bf16.mxu0 %v1451_v26  ;;  %1180 = vmatprep.subr.bf16.mxu1 %v1330_v10 }
 0xc36   :  { %899 = vmatpush1.bf16.msra.mxu0 %v1456_v27 }
 0xc37   :  { %900 = vmatprep.subr.bf16.mxu0 %v1463_v28 }
 0xc3a   :  { %901 = vmatpush1.bf16.msra.mxu0 %v1468_v29 }
 0xc3b   :  { %902 = vmatprep.subr.bf16.mxu0 %v1475_v30 }
 0xc3e   :  { %903 = vmatpush1.bf16.msra.mxu0 %v1480_v31 }
 0xc3f   :  { %1192 = vmatprep.subr.bf16.mxu0 %v1330_v10 }
 0xcf1   :  { %v768_v1 = vpop.f32.mrf.mxu0 }
 0xcf2   :  { %v775_v3 = vadd.f32 %v768_v1, %v283_v0 }
 0xcf3   :  { %v770_v2 = vpop.f32.mrf.mxu0 }
 0xcf4   :  { %v776_v26 = vadd.f32 %v770_v2, %v285_v25  ;;  %v1154_v29 = vmul.f32 -1.442695, %v775_v3 }
 0xcf5   :  { %v772_v4 = vpop.f32.mrf.mxu0 }
 0xcf6   :  { %1291 = vtanh.f32 %v776_v26  ;;  %v1155_v9 = vmul.f32 -1.442695, %v776_v26  ;;  %v1226_v26 = vld [vmem:[%s1681_s7 + $0x10] sm:$0xff]   ;;  %v1227_v4 = vld [vmem:[%s1681_s7 + $0x8] sm:$0xff]  }
 0xcf7   :  { %v773_v27 = vpop.f32.mrf.mxu0  ;;  %1293 = vpow2.f32 %v1154_v29 }
 0xd03   :  { %v1292_v28 = vpop.eup %1291 }
 0xd04   :  { %792 = vrot.lane.b32.xlu1 %v1292_v28, %s1329_s12  ;;  %v1294_v30 = vpop.eup %1293 }
 0xd05   :  { %v783_v31 = vadd.f32 1.0, %v1294_v30  ;;  %v1228_v30 = vld [vmem:[%s1681_s7] sm:$0xff]  }
 0xd07   :  { %1295 = vrcp.f32 %v783_v31  ;;  %v1229_v31 = vld [vmem:[%s1682_s9 + $0x8] sm:$0xff]  }
 0xd14   :  { %v1296_v5 = vpop.eup %1295 }
 0xd15   :  { %v790_v22 = vmul.f32 %v1296_v5, %v723_v55 }
 0xd76   :  { %v793_v21 = vpop.permute.xlu1 %792 }
 0xd77   :  { %v795_v6 = vmul.f32 %v1296_v5, %v793_v21 }
 0xd79   :  { %797 = vrot.lane.b32.xlu0 %v795_v6, %s1329_s12 }
 0xdeb   :  { %v798_v7 = vpop.permute.xlu0 %797 }
 0xdec   :  { %v800_v8 = vadd.f32 %v798_v7, %v790_v22 }
 0xdee   :  { %1297 = vtanh.f32 %v800_v8 }
 0xdef   :  { %1299 = vpow2.f32 %v1155_v9 }
 0xdfb   :  { %v1298_v24 = vpop.eup %1297 }
 0xdfc   :  { %803 = vrot.lane.b32.xlu1 %v1298_v24, %s1329_s12  ;;  %v1300_v11 = vpop.eup %1299 }
 0xdfd   :  { %v784_v12 = vadd.f32 1.0, %v1300_v11  ;;  %v1230_v11 = vld [vmem:[%s1682_s9] sm:$0xff]  }
 0xdff   :  { %1301 = vrcp.f32 %v784_v12  ;;  %v16_v12 = vstv %s1683_s10 }
 0xe00   :  { %17 = vst [vmem:[#allocation2] sm:$0x1] %v16_v12 }
 0xe0c   :  { %v1302_v13 = vpop.eup %1301 }
 0xe6e   :  { %v804_v14 = vpop.permute.xlu1 %803 }
 0xe6f   :  { %v806_v15 = vmul.f32 %v1302_v13, %v804_v14  ;;  %v1162_v13 = vld [vmem:[%s1684_s8] ss:$0 sm:$0xff] }
 0xe71   :  { %v807_v17 = vpack.c.bf16 %v806_v15, %v806_v15 }
 0xe73   :  { %1156 = vmatmul.mubr.msk.bf16.vlgmr.msra.gmra.mxu1 %vm345_vm4, %v807_v17 }
 0xe74   :  { %1181 = vmatpush3.bf16.msra.mxu1 %v1225_v33  ;;  %1188 = vmatprep.mubr.msk.bf16.mxu1 %vm1331_vm5, %v1330_v10 }
 0xe75   :  { %1182 = vmatprep.subr.bf16.mxu1 %v1330_v10 }
 0xe78   :  { %1183 = vmatpush3.bf16.msra.mxu1 %v1226_v26 }
 0xe79   :  { %1184 = vmatprep.subr.bf16.mxu1 %v1330_v10 }
 0xe7c   :  { %1185 = vmatpush3.bf16.msra.mxu1 %v1227_v4 }
 0xe7d   :  { %1186 = vmatprep.subr.bf16.mxu1 %v1330_v10 }
 0xe80   :  { %1187 = vmatpush3.bf16.msra.mxu1 %v1228_v30 }
 0xf33   :  { %v845_v35 = vpop.f32.mrf.mxu1 }
 0xf34   :  { %v852_v37 = vadd.f32 %v845_v35, %v289_v34 }
 0xf35   :  { %v847_v38 = vpop.f32.mrf.mxu1 }
 0xf36   :  { %v853_v39 = vadd.f32 %v847_v38, %v291_v36  ;;  %v1157_v43 = vmul.f32 -1.442695, %v852_v37  ;;  %v1168_v38 = vld [vmem:[#allocation2] ss:$0 sm:$0xff] }
 0xf37   :  { %v849_v40 = vpop.f32.mrf.mxu1 }
 0xf38   :  { %1303 = vtanh.f32 %v853_v39  ;;  %v1158_v51 = vmul.f32 -1.442695, %v853_v39 }
 0xf39   :  { %v850_v41 = vpop.f32.mrf.mxu1  ;;  %1305 = vpow2.f32 %v1157_v43 }
 0xf45   :  { %v1304_v42 = vpop.eup %1303 }
 0xf46   :  { %869 = vrot.lane.b32.xlu0 %v1304_v42, %s1329_s12  ;;  %v1306_v44 = vpop.eup %1305 }
 0xf47   :  { %v860_v45 = vadd.f32 1.0, %v1306_v44 }
 0xf49   :  { %1307 = vrcp.f32 %v860_v45 }
 0xf56   :  { %v1308_v46 = vpop.eup %1307 }
 0xf57   :  { %v867_v23 = vmul.f32 %v1308_v46, %v800_v8 }
 0xfb8   :  { %v870_v16 = vpop.permute.xlu0 %869 }
 0xfb9   :  { %v872_v47 = vmul.f32 %v1308_v46, %v870_v16 }
 0xfbb   :  { %874 = vrot.lane.b32.xlu1 %v872_v47, %s1329_s12 }
0x102d   :  { %v875_v48 = vpop.permute.xlu1 %874 }
0x102e   :  { %v877_v49 = vadd.f32 %v875_v48, %v867_v23 }
0x1030   :  { %1309 = vtanh.f32 %v877_v49 }
0x1031   :  { %1311 = vpow2.f32 %v1158_v51 }
0x103d   :  { %v1310_v50 = vpop.eup %1309 }
0x103e   :  { %880 = vrot.lane.b32.xlu0 %v1310_v50, %s1329_s12  ;;  %v1312_v52 = vpop.eup %1311 }
0x103f   :  { %v861_v18 = vadd.f32 1.0, %v1312_v52 }
0x1041   :  { %1313 = vrcp.f32 %v861_v18 }
0x104e   :  { %v1314_v53 = vpop.eup %1313 }
0x10b0   :  { %v881_v19 = vpop.permute.xlu0 %880 }
0x10b1   :  { %v883_v54 = vmul.f32 %v1314_v53, %v881_v19 }
0x10b3   :  { %v884_v55 = vpack.c.bf16 %v883_v54, %v883_v54 }
0x10b5   :  { %1159 = vmatmul.mubr.msk.bf16.vlgmr.msra.gmra.mxu0 %vm345_vm4, %v884_v55 }
0x10b6   :  { %1196 = vmatprep.mubr.msk.bf16.mxu0 %vm1331_vm5, %v1330_v10  ;;  %1193 = vmatpush3.bf16.msra.mxu0 %v1229_v31 }
0x10b7   :  { %1194 = vmatprep.subr.bf16.mxu0 %v1330_v10 }
0x10ba   :  { %1195 = vmatpush3.bf16.msra.mxu0 %v1230_v11 }
0x1175   :  { %v922_v57 = vpop.f32.mrf.mxu0 }
0x1176   :  { %v929_v59 = vadd.f32 %v922_v57, %v293_v56 }
0x1177   :  { %v924_v60 = vpop.f32.mrf.mxu0 }
0x1178   :  { %v930_v61 = vadd.f32 %v924_v60, %v295_v58  ;;  %v1160_v1 = vmul.f32 -1.442695, %v929_v59 }
0x1179   :  { %v926_v62 = vpop.f32.mrf.mxu0 }
0x117a   :  { %1315 = vtanh.f32 %v930_v61  ;;  %v1161_v21 = vmul.f32 -1.442695, %v930_v61 }
0x117b   :  { %v927_v63 = vpop.f32.mrf.mxu0  ;;  %1317 = vpow2.f32 %v1160_v1 }
0x1187   :  { %v1316_v0 = vpop.eup %1315 }
0x1188   :  { %946 = vrot.lane.b32.xlu1 %v1316_v0, %s1329_s12  ;;  %v1318_v25 = vpop.eup %1317 }
0x1189   :  { %v937_v3 = vadd.f32 1.0, %v1318_v25 }
0x118b   :  { %1319 = vrcp.f32 %v937_v3 }
0x1198   :  { %v1320_v2 = vpop.eup %1319 }
0x1199   :  { %v944_v27 = vmul.f32 %v1320_v2, %v877_v49 }
0x11fa   :  { %v947_v20 = vpop.permute.xlu1 %946 }
0x11fb   :  { %v949_v32 = vmul.f32 %v1320_v2, %v947_v20 }
0x11fd   :  { %951 = vrot.lane.b32.xlu0 %v949_v32, %s1329_s12 }
0x126f   :  { %v952_v28 = vpop.permute.xlu0 %951 }
0x1270   :  { %v954_v29 = vadd.f32 %v952_v28, %v944_v27 }
0x1272   :  { %1321 = vtanh.f32 %v954_v29 }
0x1273   :  { %1323 = vpow2.f32 %v1161_v21 }
0x127f   :  { %v1322_v5 = vpop.eup %1321 }
0x1280   :  { %957 = vrot.lane.b32.xlu1 %v1322_v5, %s1329_s12  ;;  %v1324_v6 = vpop.eup %1323 }
0x1281   :  { %v938_v22 = vadd.f32 1.0, %v1324_v6 }
0x1283   :  { %1325 = vrcp.f32 %v938_v22 }
0x1290   :  { %v1326_v7 = vpop.eup %1325 }
0x12f2   :  { %v958_v8 = vpop.permute.xlu1 %957 }
0x12f3   :  { %v960_v24 = vmul.f32 %v1326_v7, %v958_v8 }
0x12f5   :  { %v961_v9 = vpack.c.bf16 %v960_v24, %v960_v24 }
0x12f7   :  { %1189 = vmatmul.mubr.msk.bf16.vlgmr.msra.gmra.mxu1 %vm345_vm4, %v961_v9 }
0x13b7   :  { %v1038_v14 = vpop.f32.mrf.mxu1 }
0x13b8   :  { %v1039_v15 = vadd.f32 %v1162_v13, %v1038_v14 }
0x13b9   :  { %v1190_v17 = vpop.f32.mrf.mxu1 }
0x13ba   :  { %v1044_v34 = vmax.f32 %v1039_v15, 0.0 }
0x13bb   :  { %v1041_v35 = vpop.f32.mrf.mxu1 }
0x13bc   :  { %v1045_v36 = vpack.c.bf16 %v1044_v34, %v1044_v34 }
0x13bd   :  { %v1191_v37 = vpop.f32.mrf.mxu1 }
0x13be   :  { %1197 = vmatmul.mubr.msk.bf16.vlgmr.msra.gmra.mxu0 %vm211_vm3, %v1045_v36 }
0x147e   :  { %v1106_v39 = vpop.f32.mrf.mxu0 }
0x147f   :  { %v1107_v40 = vadd.f32 %v1168_v38, %v1106_v39 }
0x1480   :  { %v1198_v41 = vpop.f32.mrf.mxu0 }
0x1481   :  { %v1112_v42 = vmax.f32 %v1107_v40, 0.0 }
0x1482   :  { %v1109_v43 = vpop.f32.mrf.mxu0 }
0x1483   :  { %1114 = vst.msk [vmem:[%s1685_s11] sm:$0xf] %vm1113_vm6, %v1112_v42 }
0x1484   :  { %v1199_v44 = vpop.f32.mrf.mxu0 }

</bundles_post_ra>
